<compile_context>
chip_gen: v7x
topology: tpu7x:2x2x1
jax: 0.10.0
libtpu: 0.0.40
codegen_flags: <defaults>
</compile_context>

<pallas_src>
import jax
import jax.numpy as jnp
from jax import lax
from jax.experimental import pallas as pl
from jax.experimental.pallas import tpu as pltpu

_LANE = 128
_SUB_ROWS = 64                            # rows per inner fori_loop iteration
_TARGET_BLOCK_BYTES = 4 * 1024 * 1024     # per-input VMEM block
_VMEM_LIMIT_BYTES = 32 * 1024 * 1024      # fits v5e/v6e/v7x physical VMEM


def _round_up(x, m):
    return ((x + m - 1) // m) * m


def _make_kernel(R, TR, C, needs_mask):
    """Builds the kernel for row extent R, block rows TR, C chunks per split."""
    n_full = TR // _SUB_ROWS
    rem = TR - n_full * _SUB_ROWS
    # rem > 0 only happens when TR == R (full extent => no padded rows), so the
    # static tail slice below never needs masking.
    assert not (needs_mask and rem > 0)

    def kernel(gamma_ref, pred_ref, gt_ref, out_ref):
        b = pl.program_id(0)
        p = pl.program_id(1)
        c = pl.program_id(2)

        # Output doubles as the accumulator: zero it on the first reduction step.
        @pl.when(c == 0)
        def _():
            out_ref[...] = jnp.zeros_like(out_ref)

        g = gamma_ref[b]                  # per-batch scalar gamma (SMEM)
        coef_a = 2.0 * g - 1.0            # weight = coef_a * gt + coef_b
        coef_b = 1.0 - g

        L = pred_ref.shape[2]

        if needs_mask:
            chunk = p * C + c             # un-clamped global chunk id
            valid = R - chunk * TR        # valid rows in this block (may be <=0)
            row_iota = lax.broadcasted_iota(jnp.int32, (_SUB_ROWS, L), 0)

        def wse(pred_blk, gt_blk):
            pred_f = pred_blk.astype(jnp.float32)
            gt_f = gt_blk.astype(jnp.float32)
            diff = pred_f - gt_f
            return (coef_a * gt_f + coef_b) * (diff * diff)

        def body(s, acc):
            start = pl.multiple_of(s * _SUB_ROWS, _SUB_ROWS)
            err = wse(pred_ref[0, pl.ds(start, _SUB_ROWS), :],
                      gt_ref[0, pl.ds(start, _SUB_ROWS), :])
            if needs_mask:
                # SELECT zero for padded rows: garbage (NaN/Inf) cannot leak.
                err = jnp.where(row_iota < (valid - start), err, 0.0)
            return acc + jnp.sum(err, axis=0, keepdims=True)

        acc = jnp.zeros((1, L), jnp.float32)
        if n_full > 0:
            acc = lax.fori_loop(0, n_full, body, acc,
                                unroll=(2 if n_full >= 2 else 1))
        if rem > 0:
            # Static tail (only when TR == R, i.e. the block exactly covers the
            # array rows) -> reads only real data, no masking needed.
            off = n_full * _SUB_ROWS
            err = wse(pred_ref[0, pl.ds(off, rem), :],
                      gt_ref[0, pl.ds(off, rem), :])
            acc = acc + jnp.sum(err, axis=0, keepdims=True)

        out_ref[...] += acc[None, None]   # (1, L) -> (1, 1, 1, L)

    return kernel


def custom_mse_loss(pred, gt, gamma, w=None, *,
                    max_block_bytes=_TARGET_BLOCK_BYTES):
    """Pallas implementation of CustomMSELoss.forward (self.gamma is None)."""
    B, H, W = pred.shape
    assert gt.shape == (B, H, W)
    assert gamma.shape == (B,)
    N = H * W
    itemsize = pred.dtype.itemsize

    # Choose a lane-dense view when possible.  Both options are free
    # (bitcast reshape / no reshape) -> no extra HBM traffic at the
    # pallas_call custom-call boundary.
    if N % _LANE == 0:
        R, L = N // _LANE, _LANE
        pred_v = pred.reshape(B, R, L)
        gt_v = gt.reshape(B, R, L)
    else:
        # TODO(synk): W far from a multiple of 128 leaves some lane padding in
        # VMEM/compute, but avoids any wrapper-side pad/copy of the inputs.
        R, L = H, W
        pred_v = pred
        gt_v = gt

    lane_alloc = _round_up(L, _LANE)
    tr_cap = max(
        _SUB_ROWS,
        (max_block_bytes // (lane_alloc * itemsize)) // _SUB_ROWS * _SUB_ROWS,
    )
    if R <= tr_cap:
        TR = R              # full row extent: exact block, no padded rows
    else:
        TR = tr_cap         # multiple of 64 (also a multiple of 8/16/32)

    n_chunks = pl.cdiv(R, TR)
    P = 2 if n_chunks >= 2 else 1        # megacore split of the chunk axis
    C = pl.cdiv(n_chunks, P)
    needs_mask = (P * C * TR) != R       # any padded / duplicated rows?

    kernel = _make_kernel(R, TR, C, needs_mask)

    def in_map(b, p, c, gamma_ref):
        # Clamp the (rare) overhang step of the megacore split onto the last
        # valid chunk instead of issuing an OOB DMA; the kernel masks its
        # contribution to zero.
        return (b, jnp.minimum(p * C + c, n_chunks - 1), 0)

    def out_map(b, p, c, gamma_ref):
        return (b, p, 0, 0)

    cost = pl.CostEstimate(
        flops=9 * B * N,
        transcendentals=0,
        bytes_accessed=2 * B * N * itemsize + 4 * B + 4 * B * P * L,
    )

    partial = pl.pallas_call(
        kernel,
        out_shape=jax.ShapeDtypeStruct((B, P, 1, L), jnp.float32),
        grid_spec=pltpu.PrefetchScalarGridSpec(
            num_scalar_prefetch=1,
            grid=(B, P, C),
            in_specs=[
                pl.BlockSpec((1, TR, L), in_map),
                pl.BlockSpec((1, TR, L), in_map),
            ],
            out_specs=pl.BlockSpec((1, 1, 1, L), out_map),
        ),
        compiler_params=pltpu.CompilerParams(
            dimension_semantics=("parallel", "parallel", "arbitrary"),
            vmem_limit_bytes=_VMEM_LIMIT_BYTES,
        ),
        cost_estimate=cost,
    )(gamma.astype(jnp.float32), pred_v, gt_v)

    loss = jnp.sum(partial) / jnp.float32(B * N)   # .mean() over all elements
    if w is not None:
        return jnp.mean(loss * w)                  # (loss * w).mean()
    return loss                                    # loss.mean() of a scalar


def _reference(pred, gt, gamma, w=None):
    g = gamma[:, None, None]
    weight = g * gt + (1.0 - g) * (1.0 - gt)
    loss = jnp.mean(weight * (pred - gt) ** 2)
    if w is not None:
        return jnp.mean(loss * w)
    return loss


if __name__ == "__main__":
    key = jax.random.PRNGKey(0)

    def check(B, H, W, with_w, **kwargs):
        ks = jax.random.split(jax.random.fold_in(key, B * 100000 + H * 1000 + W), 4)
        pred = jax.random.normal(ks[0], (B, H, W), dtype=jnp.float32)
        gt = jax.random.uniform(ks[1], (B, H, W), dtype=jnp.float32)
        gamma = jax.random.uniform(ks[2], (B,), dtype=jnp.float32)
        w = jax.random.uniform(ks[3], (B,), dtype=jnp.float32) if with_w else None
        out = jax.block_until_ready(custom_mse_loss(pred, gt, gamma, w=w, **kwargs))
        ref = _reference(pred, gt, gamma, w=w)
        assert jnp.allclose(out, ref, rtol=1e-5, atol=1e-6), (B, H, W, out, ref)

    # Lane-aligned path (H*W % 128 == 0), tiny image.
    check(2, 16, 16, False)
    check(2, 16, 16, True)
    # H*W not a multiple of 128 -> direct (B, H, W) streaming path, no pad.
    check(2, 9, 20, False)
    check(2, 9, 20, True)
    # Exercises the in-kernel fori_loop over 64-row slices.
    check(2, 128, 128, True)
    # Small block override: multi-chunk grid + megacore split + in-kernel
    # masking of the ragged tail chunk (n_chunks = 2, last chunk half valid).
    check(1, 96, 128, True, max_block_bytes=32 * 1024)
    # ... plus a clamped duplicate chunk from the odd split (n_chunks = 3).
    check(1, 160, 128, True, max_block_bytes=32 * 1024)

    print("KERNEL_OK")
</pallas_src>

<mosaic_0001>
module attributes {stable_mosaic.version = 11 : i64} {
  func.func @kernel(%arg0: i32, %arg1: i32, %arg2: i32, %arg3: memref<2xf32, #tpu.memory_space<smem>>, %arg4: memref<1x2x128xf32, #tpu.memory_space<vmem>>, %arg5: memref<1x2x128xf32, #tpu.memory_space<vmem>>, %arg6: memref<1x1x1x128xf32, #tpu.memory_space<vmem>>) attributes {dimension_semantics = [#tpu.dimension_semantics<parallel>, #tpu.dimension_semantics<parallel>, #tpu.dimension_semantics<arbitrary>], iteration_bounds = array<i64: 2, 1, 1>, scalar_prefetch = 1 : i64, scratch_operands = 0 : i64, tpu.core_type = #tpu.core_type<tc>, window_params = [{transform_indices = @transform_0, window_bounds = array<i64: 1, 2, 128>}, {transform_indices = @transform_1, window_bounds = array<i64: 1, 2, 128>}, {transform_indices = @transform_2, window_bounds = array<i64: 1, 1, 1, 128>}]} {
    %c0_i32 = arith.constant 0 : i32
    %0 = arith.cmpi eq, %arg2, %c0_i32 : i32
    %1 = arith.extui %0 : i1 to i32
    %c0_i32_0 = arith.constant 0 : i32
    %2 = arith.cmpi ne, %1, %c0_i32_0 : i32
    scf.if %2 {
      %cst_18 = arith.constant 0.000000e+00 : f32
      %27 = vector.broadcast %cst_18 : f32 to vector<1x1x1x128xf32>
      %c0_19 = arith.constant 0 : index
      %c0_20 = arith.constant 0 : index
      %c0_21 = arith.constant 0 : index
      %c0_22 = arith.constant 0 : index
      %28 = vector.load %arg6[%c0_19, %c0_20, %c0_21, %c0_22] : memref<1x1x1x128xf32, #tpu.memory_space<vmem>>, vector<1x1x1x128xf32>
      tpu.vector_store %arg6[%c0_19, %c0_20, %c0_21, %c0_22], %27 {strides = array<i32>} : memref<1x1x1x128xf32, #tpu.memory_space<vmem>>, vector<1x1x1x128xf32>,
    } else {
    }
    %3 = arith.index_cast %arg0 : i32 to index
    %4 = memref.load %arg3[%3] : memref<2xf32, #tpu.memory_space<smem>>
    %cst = arith.constant 2.000000e+00 : f32
    %5 = arith.mulf %cst, %4 : f32
    %cst_1 = arith.constant 1.000000e+00 : f32
    %6 = arith.subf %5, %cst_1 : f32
    %cst_2 = arith.constant 1.000000e+00 : f32
    %7 = arith.subf %cst_2, %4 : f32
    %cst_3 = arith.constant 0.000000e+00 : f32
    %8 = vector.broadcast %cst_3 : f32 to vector<1x128xf32>
    %c0 = arith.constant 0 : index
    %c0_4 = arith.constant 0 : index
    %c0_5 = arith.constant 0 : index
    %9 = vector.load %arg4[%c0, %c0_4, %c0_5] : memref<1x2x128xf32, #tpu.memory_space<vmem>>, vector<1x2x128xf32>
    %10 = vector.shape_cast %9 : vector<1x2x128xf32> to vector<2x128xf32>
    %c0_6 = arith.constant 0 : index
    %c0_7 = arith.constant 0 : index
    %c0_8 = arith.constant 0 : index
    %11 = vector.load %arg5[%c0_6, %c0_7, %c0_8] : memref<1x2x128xf32, #tpu.memory_space<vmem>>, vector<1x2x128xf32>
    %12 = vector.shape_cast %11 : vector<1x2x128xf32> to vector<2x128xf32>
    %13 = arith.subf %10, %12 : vector<2x128xf32>
    %14 = vector.broadcast %6 : f32 to vector<2x128xf32>
    %15 = arith.mulf %14, %12 : vector<2x128xf32>
    %16 = vector.broadcast %7 : f32 to vector<2x128xf32>
    %17 = arith.addf %15, %16 : vector<2x128xf32>
    %18 = arith.mulf %13, %13 : vector<2x128xf32>
    %19 = arith.mulf %17, %18 : vector<2x128xf32>
    %cst_9 = arith.constant dense<0.000000e+00> : vector<128xf32>
    %20 = vector.multi_reduction <add>, %19, %cst_9 [0] : vector<2x128xf32> to vector<128xf32>
    %21 = vector.shape_cast %20 : vector<128xf32> to vector<1x128xf32>
    %22 = arith.addf %8, %21 : vector<1x128xf32>
    %c0_10 = arith.constant 0 : index
    %c0_11 = arith.constant 0 : index
    %c0_12 = arith.constant 0 : index
    %c0_13 = arith.constant 0 : index
    %23 = vector.load %arg6[%c0_10, %c0_11, %c0_12, %c0_13] : memref<1x1x1x128xf32, #tpu.memory_space<vmem>>, vector<1x1x1x128xf32>
    %24 = vector.shape_cast %22 : vector<1x128xf32> to vector<1x1x1x128xf32>
    %25 = arith.addf %23, %24 : vector<1x1x1x128xf32>
    %c0_14 = arith.constant 0 : index
    %c0_15 = arith.constant 0 : index
    %c0_16 = arith.constant 0 : index
    %c0_17 = arith.constant 0 : index
    %26 = vector.load %arg6[%c0_14, %c0_15, %c0_16, %c0_17] : memref<1x1x1x128xf32, #tpu.memory_space<vmem>>, vector<1x1x1x128xf32>
    tpu.vector_store %arg6[%c0_14, %c0_15, %c0_16, %c0_17], %25 {strides = array<i32>} : memref<1x1x1x128xf32, #tpu.memory_space<vmem>>, vector<1x1x1x128xf32>,
    return
  }
  func.func @transform_0(%arg0: i32, %arg1: i32, %arg2: i32, %arg3: memref<2xf32, #tpu.memory_space<smem>>) -> (i32, i32, i32) {
    %c1_i32 = arith.constant 1 : i32
    %0 = arith.muli %arg1, %c1_i32 : i32
    %1 = arith.addi %0, %arg2 : i32
    %c0_i32 = arith.constant 0 : i32
    %2 = arith.minsi %1, %c0_i32 : i32
    %c0_i32_0 = arith.constant 0 : i32
    %c0_i32_1 = arith.constant 0 : i32
    return %arg0, %2, %c0_i32_0 : i32, i32, i32
  }
  func.func @transform_1(%arg0: i32, %arg1: i32, %arg2: i32, %arg3: memref<2xf32, #tpu.memory_space<smem>>) -> (i32, i32, i32) {
    %c1_i32 = arith.constant 1 : i32
    %0 = arith.muli %arg1, %c1_i32 : i32
    %1 = arith.addi %0, %arg2 : i32
    %c0_i32 = arith.constant 0 : i32
    %2 = arith.minsi %1, %c0_i32 : i32
    %c0_i32_0 = arith.constant 0 : i32
    %c0_i32_1 = arith.constant 0 : i32
    return %arg0, %2, %c0_i32_0 : i32, i32, i32
  }
  func.func @transform_2(%arg0: i32, %arg1: i32, %arg2: i32, %arg3: memref<2xf32, #tpu.memory_space<smem>>) -> (i32, i32, i32, i32) {
    %c0_i32 = arith.constant 0 : i32
    %c0_i32_0 = arith.constant 0 : i32
    %c0_i32_1 = arith.constant 0 : i32
    return %arg0, %arg1, %c0_i32, %c0_i32_0 : i32, i32, i32, i32
  }
}

</mosaic_0001>

<bundles_post_ra>
// kernel: tpu_custom_call.1
= control target key start
LH: loop header
LB: loop body
LE: loop exit
PB: predicated region body
PF: predicated region fallthrough
CT: control target
= control target key end

     0   :  { %s810_s0 = inlined_call_operand.hbm [shape: f32[2], index: 0, kind: input, shape index: {}]   ;;  %s811_s1 = inlined_call_operand.hbm [shape: f32[2,2,128], index: 1, kind: input, shape index: {}]   ;;  %s812_s2 = inlined_call_operand.vmem [shape: f32[2,2,128], index: 2, kind: input, shape index: {}]   ;;  %s813_s3 = inlined_call_operand.hbm [shape: f32[2,1,1,128], index: 3, kind: output, shape index: {}]  }
   0x1   :  { %s463_s14 = scalar_lea.hbm %s810_s0, 16 }
   0x2   :  { %p464_p0 = scmp.ne.s32.totalorder %s810_s0, %s463_s14  ;;  %p467_p1 = scmp.lt.u32.totalorder %s463_s14, %s810_s0 }
   0x4   :  { %p469_p2 = pnand %p467_p1, %p464_p0 }
   0x6   :  { %472 = shalt.err (!%p469_p2)  }
   0x7   :  { %s589_s19 = smov [#allocation3]  }
   0x8   :  { %9 = dma.hbm_to_smem %s810_s0, 16, %s589_s19, [#allocation2] }
   0x9   :  { %555 = dma.done.wait [#allocation2], 16 }
   0xa   :  { %556 = vsyncadd [#allocation2], 4294967280 }
   0xb   :  { %11 = sfence }
   0xc   :  { %12 = vsyncpa [#allocation5], 0 }
   0xd   :  { %14 = vsyncpa [#allocation5 + $0x1], 0 }
   0xe   :  { %15 = vsyncpa [#allocation6], 0 }
   0xf   :  { %17 = vsyncpa [#allocation6 + $0x1], 0  ;;  %s625_s22 = smov 0   ;;  %s627_s23 = smov 0  }
  0x10   :  { %s629_s24 = smov 0   ;;  %s631_s25 = smov 0  }
  0x11   :  { %s633_s26 = smov 0   ;;  %s635_s27 = smov 0  }
  0x12 LB: > { %s386_s0 = sadd.s32 4294967295, %s587_s27   ;;  %s387_s28 = sadd.s32 4294967294, %s587_s27   ;;  %s587_s27 = sphi %s635_s27, %s23_s27   ;;  %s583_s26 = sphi %s633_s26, %s829_s26   ;;  %s579_s25 = sphi %s631_s25, %s828_s25   ;;  %s575_s24 = sphi %s629_s24, %s827_s24   ;;  %s571_s23 = sphi %s627_s23, %s826_s23   ;;  %s567_s22 = sphi %s625_s22, %s825_s22  }
  0x13   : > { %s42_s29 = sadd.s32 1, %s583_s26  ;;  %s57_s30 = sadd.s32 1, %s575_s24 }
  0x14   : > { %p44_p3 = scmp.ge.s32.totalorder %s42_s29, 2  ;;  %p64_p4 = scmp.ne.s32.totalorder %s575_s24, %s571_s23 }
  0x15   : > { %p65_p5 = scmp.eq.s32.totalorder %s587_s27, 0  ;;  %p70_p6 = scmp.ne.s32.totalorder %s571_s23, %s567_s22 }
  0x16   : > { %s831_s29 = smov (%p44_p3, %s42_s29), 0  ;;  %p71_p8 = scmp.eq.s32.totalorder %s386_s0, 0 }
  0x17   : > { %p666_p7 = por %p65_p5, %p64_p4  ;;  %s52_s5 = ssub.s32 %s583_s26, %s831_s29 }
  0x18   : > { %p130_p9 = scmp.eq.s32.totalorder %s386_s0, 1  ;;  %p55_p10 = scmp.eq.s32.totalorder %s52_s5, 0 }
  0x19   : > { %p672_p11 = por %p71_p8, %p70_p6  ;;  %p136_p13 = scmp.eq.s32.totalorder %s387_s28, 1 }
  0x1a   : > { %p676_p12 = por %p130_p9, %p64_p4  ;;  %p411_p2 = scmp.lt.s32.totalorder %s587_s27, 2 }
  0x1b   : > { %s681_s8 = scalar_select %p55_p10, %s575_s24, %s57_s30  }
  0x1c   : > { %s817_s7 = scalar_select %p676_p12, 1, 0 }
  0x1d   : > { %p683_p0 = por %p136_p13, %p70_p6  ;;  %s156_s10 = sand.u32 1, %s575_s24  }
  0x1e   : > { %s390_s11 = sshll.u32 %s156_s10, 1  ;;  %s391_s12 = sshll.u32 %s583_s26, 5 }
  0x1f   : > { %s818_s9 = scalar_select %p683_p0, 1, 0 }
  0x20   : > { %s694_s15 = scalar_lea.hbm %s811_s1, %s391_s12  ;;  %s160_s16 = scalar_lea.vmem [#allocation4], %s390_s11 }
  0x21   : > { %s171_s17 = sshll.u32 %s160_s16, 4  ;;  %p700_p3 = pnand %p411_p2, %p666_p7  ;;  %s696_s17 = int_to_ptr.vmem [resolvable:$true] %s171_s17 }
  0x22   : > { %s157_s19 = scalar_lea.sflag [#allocation5], %s156_s10  ;;  %s473_s20 = scalar_lea.hbm %s694_s15, 32 }
  0x23   : > { %p474_p6 = scmp.ne.s32.totalorder %s694_s15, %s473_s20  ;;  %p475_p8 = pneg %p700_p3 }
  0x24   : > { %s478_s28 = scalar_lea.hbm %s811_s1, 64  ;;  %p479_p7 = scmp.lt.u32.totalorder %s694_s15, %s811_s1 }
  0x25   : > { %p476_p9 = pnand %p475_p8, %p474_p6  ;;  %p480_p13 = scmp.lt.u32.totalorder %s478_s28, %s473_s20 }
  0x26   : > { %p482_p1 = scmp.lt.u32.totalorder %s473_s20, %s694_s15 }
  0x27   : > { %p477_p10 = pneg %p476_p9  ;;  %p481_p2 = por %p480_p13, %p479_p7 }
  0x29   : > { %p483_p4 = por %p482_p1, %p481_p2 }
  0x2b   : > { %p484_p5 = pnand %p483_p4, %p477_p10 }
  0x2d   : > { %487 = shalt.err (!%p484_p5)
}
  0x2e   : > { %s488_s5 = scalar_lea.vmem %s696_s17, 32  ;;  %s590_s10 = smov [#allocation4]  }
  0x2f   : > { %p489_p6 = scmp.ne.s32.totalorder %s696_s17, %s488_s5  ;;  %s493_s11 = sshll.u32 %s590_s10, 4  ;;  %s494_s11 = int_to_ptr.vmem [resolvable:$false] %s493_s11 }
  0x30   : > { %s495_s12 = scalar_lea.vmem %s494_s11, 64  ;;  %p496_p12 = scmp.lt.s32.totalorder %s696_s17, %s494_s11 }
  0x31   : > { %p491_p9 = pnand %p489_p6, %p475_p8  ;;  %p497_p7 = scmp.lt.s32.totalorder %s495_s12, %s488_s5 }
  0x33   : > { %p492_p0 = pneg %p491_p9  ;;  %p498_p13 = por %p497_p7, %p496_p12 }
  0x35   : > { %p499_p1 = pnand %p498_p13, %p492_p0 }
  0x37   : > { %502 = shalt.err (!%p499_p1)
}
  0x38   : > { %406 = dma.hbm_to_vmem [thread:$0]  (!%p700_p3), %s694_s15, 32, %s696_s17, %s157_s19  }
  0x39   : > { %p820_p4 = scmp.lt.s32.totalorder %s587_s27, 3  ;;  %p821_p5 = scmp.ge.s32.totalorder %s587_s27, 1 }
  0x3b   : > { %p193_p8 = pnand %p821_p5, %p820_p4 }
  0x3c   : > { %s736_s13 = sand.u32 (!%p193_p8), 1, %s571_s23  }
  0x3d   : > { %196 = sbr.rel (%p193_p8) target bundleno = 115 (0x73), region = 28  ;;  %s393_s14 = sshll.u32 (!%p193_p8), %s736_s13, 1 }
  0x3e   : > { %s199_s16 = scalar_lea.sflag (!%p193_p8), [#allocation5], %s736_s13  ;;  %s202_s20 = scalar_lea.vmem (!%p193_p8), [#allocation4], %s393_s14 }
  0x44   : > { %558 = dma.done.wait (%p672_p11), %s199_s16, 32  }
  0x45   : > { %560 = vsyncadd (%p672_p11), %s199_s16, 4294967264  ;;  %p238_p12 = scmp.lt.s32.totalorder %s579_s25, 1  ;;  %s253_s15 = sld [smem:[#allocation3 + %s579_s25]]  ;;  %v591_v0 = vmov 0.0   ;;  %v257_v1 = vld [vmem:[%s202_s20] sm:$0x3] }
  0x46   : > { %s747_s17 = scalar_lea.vmem [#allocation7], %s736_s13  ;;  %vm266_vm0 = vcmask 1041408   ;;  %s396_s5 = sshll.u32 %s579_s25, 4 }
  0x47   : > { %252 = vst [vmem:[%s747_s17] sm:$0x1] %v591_v0  ;;  %s239_s18 = scalar_select %p238_p12, %s579_s25, 1 }
  0x48   : > { %s292_s10 = sshll.u32 %s747_s17, 4  ;;  %s760_s14 = scalar_lea.hbm %s813_s3, %s396_s5  ;;  %s762_s10 = int_to_ptr.vmem [resolvable:$true] %s292_s10 }
  0x49   : > { %s394_s19 = sshll.u32 %s239_s18, 1  ;;  %s279_s16 = scalar_lea.sflag [#allocation6], %s736_s13 }
  0x4a   : > { %s244_s28 = scalar_lea.vmem %s812_s2, %s394_s19  ;;  %s503_s20 = scalar_lea.vmem %s762_s10, 16 }
  0x4b   : > { %s254_s30 = smul.f32 2.0, %s253_s15  ;;  %s256_s6 = ssub.f32 1.0, %s253_s15  ;;  %v258_v2 = vld [vmem:[%s244_s28] sm:$0x3] }
  0x4c   : > { %v259_v3 = vsub.f32 %v257_v1, %v258_v2  ;;  %p504_p11 = scmp.ne.s32.totalorder %s762_s10, %s503_s20  ;;  %p822_p0 = scmp.ne.s32.totalorder %s817_s7, 0 }
  0x4d   : > { %s395_s4 = sadd.f32 -1.0, %s254_s30  ;;  %v262_v5 = vstv %s256_s6  ;;  %s592_s25 = smov [#allocation7]  }
  0x4e   : > { %v264_v7 = vmul.f32 %v259_v3, %v259_v3  ;;  %v275_v16 = vld [vmem:[%s747_s17] sm:$0x1]  ;;  %p505_p3 = pnand %p504_p11, %p822_p0  ;;  %s507_s15 = sshll.u32 %s592_s25, 4  ;;  %s508_s15 = int_to_ptr.vmem [resolvable:$false] %s507_s15 }
  0x4f   : > { %v260_v4 = vstv %s395_s4  ;;  %s509_s18 = scalar_lea.vmem %s508_s15, 32  ;;  %p510_p2 = scmp.lt.s32.totalorder %s762_s10, %s508_s15 }
  0x50   : > { %v261_v6 = vmul.f32 %v260_v4, %v258_v2  ;;  %p506_p10 = pneg %p505_p3  ;;  %p511_p6 = scmp.lt.s32.totalorder %s509_s18, %s503_s20 }
  0x52   : > { %v263_v8 = vadd.f32 %v262_v5, %v261_v6  ;;  %p512_p9 = por %p511_p6, %p510_p2 }
  0x54   : > { %v265_v9 = vmul.f32 %v264_v7, %v263_v8  ;;  %p513_p7 = pnand %p512_p9, %p506_p10 }
  0x56   : > { %v267_v10 = vsel %vm266_vm0, %v265_v9, 0.0 }
  0x57   : > { %v268_v11 = vrot.slane %v267_v10, 4 }
  0x59   : > { %v269_v12 = vadd.f32 %v268_v11, %v267_v10 }
  0x5b   : > { %v270_v13 = vrot.slane %v269_v12, 2 }
  0x5d   : > { %v271_v14 = vadd.f32 %v270_v13, %v269_v12 }
  0x5f   : > { %v272_v15 = vrot.slane %v271_v14, 1 }
  0x61   : > { %v273_v17 = vadd.f32 %v272_v15, %v271_v14 }
  0x63   : > { %v276_v18 = vadd.f32 %v275_v16, %v273_v17 }
  0x65   : > { %277 = vst [vmem:[%s747_s17] sm:$0x1] %v276_v18 }
  0x66   : > { %516 = shalt.err (!%p513_p7)
}
  0x67   : > { %s517_s13 = scalar_lea.hbm %s760_s14, 16  ;;  %s521_s21 = scalar_lea.hbm %s813_s3, 32 }
  0x68   : > { %p518_p13 = scmp.ne.s32.totalorder %s760_s14, %s517_s13  ;;  %p522_p5 = scmp.lt.u32.totalorder %s760_s14, %s813_s3 }
  0x69   : > { %p523_p8 = scmp.lt.u32.totalorder %s521_s21, %s517_s13  ;;  %p525_p11 = scmp.lt.u32.totalorder %s517_s13, %s760_s14 }
  0x6a   : > { %p519_p1 = pnand %p518_p13, %p822_p0 }
  0x6b   : > { %p524_p12 = por %p523_p8, %p522_p5 }
  0x6c   : > { %p520_p4 = pneg %p519_p1 }
  0x6d   : > { %p526_p3 = por %p525_p11, %p524_p12 }
  0x6f   : > { %p527_p10 = pnand %p526_p3, %p520_p4 }
  0x71   : > { %530 = shalt.err (!%p527_p10)
}
  0x72   : > { %401 = dma.vmem_to_hbm [thread:$0]  (%p822_p0), %s762_s10, 16, %s760_s14, %s279_s16  }
  0x73 PF: > { %s304_s30 = sand.u32 1, %s567_s22   ;;  %p823_p2 = scmp.ne.s32.totalorder %s818_s9, 0 }
  0x74   : > { %p824_p6 = scmp.ge.s32.totalorder %s587_s27, 2  ;;  %s305_s6 = scalar_lea.sflag [#allocation6], %s304_s30 }
  0x76   : > { %p408_p9 = pnand %p824_p6, %p823_p2 }
  0x78   : > { %562 = dma.done.wait (!%p408_p9), %s305_s6, 16  }
  0x79   : > { %564 = vsyncadd (!%p408_p9), %s305_s6, 4294967280  ;;  %s23_s27 = sadd.s32 1, %s587_s27   ;;  %s825_s22 = smov %s571_s23 }
  0x7a   : > { %p20_p7 = scmp.ge.s32.totalorder %s23_s27, 4   ;;  %s826_s23 = smov %s575_s24 }
  0x7b   : > { %s827_s24 = smov %s681_s8  ;;  %s828_s25 = smov %s583_s26 }
  0x7c   : > { %s829_s26 = smov %s831_s29  ;;  %22 = sbr.rel (!%p20_p7) target bundleno = 18 (0x12), region = 80 }
  0x83   :  { %309 = vsyncpa [#allocation5], 1 }
  0x84   :  { %311 = vsyncpa [#allocation5 + $0x1], 1 }
  0x85   :  { %312 = vsyncpa [#allocation6], 1 }
  0x86   :  { %314 = vsyncpa [#allocation6 + $0x1], 1 }

</bundles_post_ra>
